<compile_context>
chip_gen: v6e
topology: v6e:2x2x1
jax: 0.10.0
libtpu: 0.0.40
codegen_flags: <defaults>
</compile_context>

<pallas_src>
import math

import jax
import jax.numpy as jnp
from jax.experimental import pallas as pl
from jax.experimental.pallas import tpu as pltpu


# ----------------------------------------------------------------------------
# Helpers
# ----------------------------------------------------------------------------
def _round_up(x, m):
    return ((x + m - 1) // m) * m


def _vmem_limit_bytes():
    """Chip-aware scoped-VMEM budget: ~3/4 of physical, capped at 100 MiB.

    v7x (64 MiB physical) -> ~48 MiB; v5e/v6e (128 MiB) -> ~96 MiB.
    """
    try:
        cap = pltpu.get_tpu_info().vmem_capacity_bytes
    except Exception:
        cap = 64 * 1024 * 1024            # conservative fallback (v7x physical)
    return int(min(cap * 3 // 4, 100 * 1024 * 1024))


# ----------------------------------------------------------------------------
# One-time adjacency normalization kernel (hoisted out of the per-chunk body)
# ----------------------------------------------------------------------------
def _normalize_adj_kernel(adj_ref, out_ref):
    adj = adj_ref[...]                                    # (n_p, n_p) f32
    rs = jnp.sum(adj, axis=-1, keepdims=True)             # (n_p, 1)
    rs = jnp.where(rs == 0.0, 1.0, rs)                    # zero-degree guard
    d = jax.lax.rsqrt(rs)                                 # diag(D^-1/2), column
    out_ref[...] = (d * adj) * jnp.transpose(d, (1, 0))   # D^-1/2 A D^-1/2 (f32)


def normalize_adj(adj_p):
    n_p = adj_p.shape[0]
    return pl.pallas_call(
        _normalize_adj_kernel,
        out_shape=jax.ShapeDtypeStruct((n_p, n_p), jnp.float32),
    )(adj_p)


# ----------------------------------------------------------------------------
# Fused GCN stack: all layers in one pallas_call, grid over batch chunks
# ----------------------------------------------------------------------------
def _aggregate(adj_c, s, bc, n_p):
    """out[b] = adj_norm @ s[b] for every graph in the chunk.

    Per-graph 2-D matmuls against the single VMEM-resident (n_p, n_p)
    normalized adjacency -- no (bc, n_p, n_p) broadcast.  With feature dims
    padded to 128 every matmul here is lane-dense; accumulation stays f32.
    """
    if bc == 1:
        return jnp.dot(adj_c, s.astype(adj_c.dtype),
                       preferred_element_type=jnp.float32)
    f = s.shape[-1]
    s3 = s.reshape(bc, n_p, f).astype(adj_c.dtype)        # tile-aligned row split
    parts = [jnp.dot(adj_c, s3[b], preferred_element_type=jnp.float32)
             for b in range(bc)]
    return jnp.concatenate(parts, axis=0)                 # (bc * n_p, f)


def make_gcn_stack_kernel(num_layers, bc, n_p, compute_dtype):
    def kernel(*refs):
        # refs = x, adj_norm, (w_0, b_0, ..., w_{L-1}, b_{L-1}), out
        x_ref, adjn_ref = refs[0], refs[1]
        layer_refs = refs[2:2 + 2 * num_layers]
        out_ref = refs[2 + 2 * num_layers]

        # Pre-normalized adjacency (f32) -> matmul-operand dtype; single (n,n)
        # copy, no per-batch broadcast.
        adj_c = adjn_ref[...].astype(compute_dtype)

        act = x_ref[...]                                  # (bc*n_p, f_in_p) f32
        # NOTE: unrolled layer loop is fine at small L; for deep stacks move
        # layers 1..L-1 into lax.fori_loop over a stacked weight ref to bound
        # vreg live ranges.
        for l in range(num_layers):
            w = layer_refs[2 * l][...]                    # (f_in_l, f_out_l)
            b = layer_refs[2 * l + 1][...]                # (1, f_out_l) f32
            f_in_l, f_out_l = w.shape

            if f_in_l < f_out_l:
                # Aggregate on the narrower feature dim: ((D^-1/2 A D^-1/2) X) W
                agg = _aggregate(adj_c, act, bc, n_p)
                out = jnp.dot(agg.astype(compute_dtype), w.astype(compute_dtype),
                              preferred_element_type=jnp.float32)
            else:
                # Reference order: (D^-1/2 A D^-1/2) (X W)
                support = jnp.dot(act.astype(compute_dtype), w.astype(compute_dtype),
                                  preferred_element_type=jnp.float32)
                out = _aggregate(adj_c, support, bc, n_p)

            act = jnp.maximum(out + b, 0.0)               # bias + ReLU in f32

        out_ref[...] = act.astype(out_ref.dtype)

    return kernel


def _gcn_vmem_bytes(bc, n_p, f_in_p, f_out_p, const_bytes):
    f_max = max(f_in_p, f_out_p)
    x_blk = 2 * bc * n_p * f_in_p * 4            # double-buffered input block
    o_blk = 2 * bc * n_p * f_out_p * 4           # double-buffered output block
    live = 4 * bc * n_p * f_max * 4              # in-kernel activations / headroom
    return x_blk + o_blk + live + 2 * const_bytes


def _choose_batch_chunk(bsz, requested, n_p, f_in_p, f_out_p, const_bytes, budget):
    if requested is not None:
        assert bsz % requested == 0, "batch_chunk must divide batch"
        return requested
    # Prefer >=2 grid steps so v7x's second TensorCore gets work on the
    # "parallel" axis; shrink the chunk until the blocks fit the VMEM budget.
    preferred = bsz // 2 if bsz >= 2 else bsz
    divisors = sorted((d for d in range(1, bsz + 1) if bsz % d == 0), reverse=True)
    for bc in divisors:
        if bc <= preferred and _gcn_vmem_bytes(bc, n_p, f_in_p, f_out_p,
                                               const_bytes) <= budget:
            return bc
    return 1


def gcn_stack(x_p, adj_norm, layer_params, *, batch_chunk=None,
              compute_dtype=jnp.float32):
    """x_p: (B, n_p, f_in_p) f32 padded; adj_norm: (n_p, n_p) f32 normalized.

    layer_params: [(w_p, b_p)] with w_p already in the matmul-operand dtype and
    b_p (1, f_out_p) f32.  Returns (B*n_p, f_out_p) f32.
    """
    bsz, n_p, f_in_p = x_p.shape
    f_out_p = layer_params[-1][0].shape[1]

    vmem_budget = _vmem_limit_bytes()
    const_bytes = adj_norm.size * adj_norm.dtype.itemsize + sum(
        w.size * w.dtype.itemsize + b.size * b.dtype.itemsize
        for (w, b) in layer_params)
    bc = _choose_batch_chunk(bsz, batch_chunk, n_p, f_in_p, f_out_p,
                             const_bytes, vmem_budget)
    grid = (bsz // bc,)

    x2d = x_p.reshape(bsz * n_p, f_in_p)                  # batch packed into MXU rows

    flat_args = [x2d, adj_norm]
    in_specs = [
        pl.BlockSpec((bc * n_p, f_in_p), lambda i: (i, 0)),
        pl.BlockSpec((n_p, n_p), lambda i: (0, 0)),       # resident across chunks
    ]
    for (w, b) in layer_params:
        flat_args += [w, b]
        in_specs += [
            pl.BlockSpec(w.shape, lambda i: (0, 0)),
            pl.BlockSpec(b.shape, lambda i: (0, 0)),
        ]

    kernel = make_gcn_stack_kernel(len(layer_params), bc, n_p, compute_dtype)
    return pl.pallas_call(
        kernel,
        out_shape=jax.ShapeDtypeStruct((bsz * n_p, f_out_p), jnp.float32),
        grid=grid,
        in_specs=in_specs,
        out_specs=pl.BlockSpec((bc * n_p, f_out_p), lambda i: (i, 0)),
        compiler_params=pltpu.CompilerParams(
            dimension_semantics=("parallel",),            # chunks -> both TCs on v7x
            vmem_limit_bytes=vmem_budget,
        ),
    )(*flat_args)


# ----------------------------------------------------------------------------
# Tokenizer: (B, N*F) @ (N*F, F) + bias, K-tiled with f32 accumulator
# ----------------------------------------------------------------------------
def make_tokenizer_kernel(compute_dtype):
    def kernel(x_ref, w_ref, b_ref, out_ref, acc_ref):
        k = pl.program_id(0)

        @pl.when(k == 0)
        def _():
            acc_ref[...] = jnp.zeros_like(acc_ref)

        acc_ref[...] += jnp.dot(
            x_ref[...].astype(compute_dtype),
            w_ref[...].astype(compute_dtype),
            preferred_element_type=jnp.float32,
        )

        @pl.when(k == pl.num_programs(0) - 1)
        def _():
            out_ref[...] = acc_ref[...] + b_ref[...]

    return kernel


def _pick_k_tile(k, max_tile=2048):
    """Largest 128-multiple divisor of k that is <= max_tile (big tiles amortize
    the ~0.35 us per-grid-step overhead on this HBM-bound weight stream)."""
    if k <= max_tile:
        return k
    for t in range(max_tile, 127, -128):
        if k % t == 0:
            return t
    return k


def tokenizer(x_flat, w_t, b2d, *, k_tile=None, compute_dtype=jnp.float32):
    bsz, k = x_flat.shape
    f_out_p = w_t.shape[1]

    bp = max(8, _round_up(bsz, 8))                        # full sublane group of rows
    if bp != bsz:
        x_flat = jnp.pad(x_flat, ((0, bp - bsz), (0, 0)))

    tk = k_tile or _pick_k_tile(k)
    assert k % tk == 0

    out = pl.pallas_call(
        make_tokenizer_kernel(compute_dtype),
        out_shape=jax.ShapeDtypeStruct((bp, f_out_p), jnp.float32),
        grid=(k // tk,),
        in_specs=[
            pl.BlockSpec((bp, tk), lambda kk: (0, kk)),
            pl.BlockSpec((tk, f_out_p), lambda kk: (kk, 0)),
            pl.BlockSpec((1, f_out_p), lambda kk: (0, 0)),
        ],
        out_specs=pl.BlockSpec((bp, f_out_p), lambda kk: (0, 0)),
        scratch_shapes=[pltpu.VMEM((bp, f_out_p), jnp.float32)],
        compiler_params=pltpu.CompilerParams(
            dimension_semantics=("arbitrary",),           # K is a reduction axis
            vmem_limit_bytes=_vmem_limit_bytes(),
        ),
    )(x_flat, w_t, b2d)
    return out[:bsz]


# ----------------------------------------------------------------------------
# GraphEncoder: parameter init + forward
# ----------------------------------------------------------------------------
def init_graph_encoder_params(key, num_layers, num_node, in_features, out_features):
    params = {"gcn": []}
    for i in range(num_layers):
        in_dim = in_features if i == 0 else out_features
        stdv = 1.0 / math.sqrt(out_features)
        key, kw, kb = jax.random.split(key, 3)
        w = jax.random.uniform(kw, (in_dim, out_features), jnp.float32, -stdv, stdv)
        b = jax.random.uniform(kb, (out_features,), jnp.float32, -stdv, stdv)
        params["gcn"].append((w, b))
    # nn.Linear(num_node*out_features, out_features), stored pre-transposed.
    fan_in = num_node * out_features
    bound = 1.0 / math.sqrt(fan_in)
    key, kw, kb = jax.random.split(key, 3)
    w_tok_t = jax.random.uniform(kw, (fan_in, out_features), jnp.float32, -bound, bound)
    b_tok = jax.random.uniform(kb, (out_features,), jnp.float32, -bound, bound)
    params["tokenizer"] = (w_tok_t, b_tok)
    return params


def graph_encoder_forward(params, x, adj, *, compute_dtype=jnp.float32,
                          batch_chunk=None):
    bsz, n, f_in = x.shape
    f_out = params["gcn"][-1][0].shape[1]
    n_p = _round_up(n, 8)                                 # sublane-aligned nodes
    f_in_p = _round_up(f_in, 128)                         # lane-dense feature dims
    f_out_p = _round_up(f_out, 128)

    # One-time HBM-side padding so every matmul output / out_spec is lane-dense
    # and in-kernel reshapes never cross (8,128) tile boundaries.
    x_p = jnp.pad(x, ((0, 0), (0, n_p - n), (0, f_in_p - f_in)))
    adj_p = jnp.pad(adj, ((0, n_p - n), (0, n_p - n)))

    gcn_params_p = []
    for i, (w, b) in enumerate(params["gcn"]):
        fi_p = f_in_p if i == 0 else f_out_p
        w_p = jnp.pad(w, ((0, fi_p - w.shape[0]),
                          (0, f_out_p - w.shape[1]))).astype(compute_dtype)
        b_p = jnp.pad(b, (0, f_out_p - b.shape[0])).reshape(1, f_out_p)  # bias stays f32
        gcn_params_p.append((w_p, b_p))

    # Tokenizer weight: scatter row (node i, channel c) -> padded row i*f_out_p + c.
    # Zero rows absorb pad-node / pad-channel activations, so padding never leaks.
    w_tok_t, b_tok = params["tokenizer"]
    w_tok_p = jnp.pad(w_tok_t.reshape(n, f_out, f_out),
                      ((0, n_p - n), (0, f_out_p - f_out), (0, f_out_p - f_out)))
    w_tok_p = w_tok_p.reshape(n_p * f_out_p, f_out_p).astype(compute_dtype)
    b_tok_p = jnp.pad(b_tok, (0, f_out_p - f_out)).reshape(1, f_out_p)

    # Adjacency normalization hoisted out of the per-chunk GCN body; done in f32
    # *before* any bf16 cast of the matmul operands.
    adj_norm = normalize_adj(adj_p)                       # (n_p, n_p) f32

    act2d = gcn_stack(x_p, adj_norm, gcn_params_p, batch_chunk=batch_chunk,
                      compute_dtype=compute_dtype)        # (B*n_p, f_out_p) f32
    flat = act2d.reshape(bsz, n_p * f_out_p)              # (B, n_p*f_out_p), XLA-level
    tok = tokenizer(flat, w_tok_p, b_tok_p, compute_dtype=compute_dtype)
    return tok[:, :f_out]


# ----------------------------------------------------------------------------
# Pure-JAX reference (matches PyTorch semantics)
# ----------------------------------------------------------------------------
def reference_forward(params, x, adj):
    rowsum = jnp.sum(adj, axis=-1)
    rowsum = jnp.where(rowsum == 0.0, 1.0, rowsum)
    d = rowsum ** -0.5
    adj_norm = d[:, None] * adj * d[None, :]
    out = x
    for (w, b) in params["gcn"]:
        out = jax.nn.relu(adj_norm @ (out @ w) + b)
    out = out.reshape(out.shape[0], -1)
    w_tok_t, b_tok = params["tokenizer"]
    return out @ w_tok_t + b_tok


if __name__ == "__main__":
    batch = 2
    num_layers = 2
    num_node = 8
    in_features = 16
    out_features = 32

    key = jax.random.PRNGKey(0)
    key, kx, ka = jax.random.split(key, 3)
    x = jax.random.normal(kx, (batch, num_node, in_features), jnp.float32)
    # Symmetric 0/1 adjacency; force one isolated node to exercise the guard.
    a_raw = (jax.random.uniform(ka, (num_node, num_node)) > 0.6).astype(jnp.float32)
    adj = jnp.maximum(a_raw, a_raw.T)
    adj = adj.at[0, :].set(0.0).at[:, 0].set(0.0)

    params = init_graph_encoder_params(key, num_layers, num_node,
                                       in_features, out_features)
    ref = reference_forward(params, x, adj)

    # f32 path, default chunking (2 chunks of 1 graph -> both v7x TensorCores).
    fwd_f32 = jax.jit(lambda p, xx, aa: graph_encoder_forward(p, xx, aa))
    out = jax.block_until_ready(fwd_f32(params, x, adj))
    assert out.shape == (batch, out_features)
    assert jnp.allclose(out, ref, atol=2e-3, rtol=2e-3), "f32 mismatch vs reference"

    # f32 path, one chunk of 2 graphs (exercises the per-graph aggregation loop).
    fwd_one = jax.jit(lambda p, xx, aa: graph_encoder_forward(
        p, xx, aa, batch_chunk=batch))
    out_one = jax.block_until_ready(fwd_one(params, x, adj))
    assert jnp.allclose(out_one, ref, atol=2e-3, rtol=2e-3), "chunked mismatch"

    # bf16 MXU-operand + bf16 weight-storage path (accumulation stays f32).
    fwd_bf16 = jax.jit(lambda p, xx, aa: graph_encoder_forward(
        p, xx, aa, compute_dtype=jnp.bfloat16))
    out_bf16 = jax.block_until_ready(fwd_bf16(params, x, adj))
    assert out_bf16.shape == (batch, out_features)
    assert bool(jnp.all(jnp.isfinite(out_bf16)))
    assert jnp.allclose(out_bf16, ref, atol=0.25, rtol=0.25), "bf16 sanity mismatch"

    print("KERNEL_OK")
</pallas_src>

<mosaic_0001>
module attributes {stable_mosaic.version = 11 : i64} {
  func.func @_normalize_adj_kernel(%arg0: memref<8x8xf32, #tpu.memory_space<vmem>>, %arg1: memref<8x8xf32, #tpu.memory_space<vmem>>) attributes {dimension_semantics = [], scalar_prefetch = 0 : i64, scratch_operands = 0 : i64, tpu.core_type = #tpu.core_type<tc>} {
    %c0 = arith.constant 0 : index
    %c0_0 = arith.constant 0 : index
    %0 = vector.load %arg0[%c0, %c0_0] : memref<8x8xf32, #tpu.memory_space<vmem>>, vector<8x8xf32>
    %cst = arith.constant dense<0.000000e+00> : vector<8xf32>
    %1 = vector.multi_reduction <add>, %0, %cst [1] : vector<8x8xf32> to vector<8xf32>
    %2 = vector.shape_cast %1 : vector<8xf32> to vector<8x1xf32>
    %cst_1 = arith.constant 0.000000e+00 : f32
    %3 = vector.broadcast %cst_1 : f32 to vector<8x1xf32>
    %4 = arith.cmpf oeq, %2, %3 : vector<8x1xf32>
    %cst_2 = arith.constant 1.000000e+00 : f32
    %5 = vector.broadcast %cst_2 : f32 to vector<8x1xf32>
    %6 = arith.select %4, %5, %2 : vector<8x1xi1>, vector<8x1xf32>
    %7 = math.rsqrt %6 : vector<8x1xf32>
    %8 = vector.broadcast %7 : vector<8x1xf32> to vector<8x8xf32>
    %9 = arith.mulf %8, %0 : vector<8x8xf32>
    %10 = tpu.transpose %7, [1, 0] : vector<8x1xf32> -> vector<1x8xf32>
    %11 = vector.broadcast %10 : vector<1x8xf32> to vector<8x8xf32>
    %12 = arith.mulf %9, %11 : vector<8x8xf32>
    %c0_3 = arith.constant 0 : index
    %c0_4 = arith.constant 0 : index
    %13 = vector.load %arg1[%c0_3, %c0_4] : memref<8x8xf32, #tpu.memory_space<vmem>>, vector<8x8xf32>
    tpu.vector_store %arg1[%c0_3, %c0_4], %12 {strides = array<i32>} : memref<8x8xf32, #tpu.memory_space<vmem>>, vector<8x8xf32>,
    return
  }
}

module attributes {stable_mosaic.version = 11 : i64} {
  func.func @kernel(%arg0: i32, %arg1: memref<8x128xf32, #tpu.memory_space<vmem>>, %arg2: memref<8x8xf32, #tpu.memory_space<vmem>>, %arg3: memref<128x128xf32, #tpu.memory_space<vmem>>, %arg4: memref<1x128xf32, #tpu.memory_space<vmem>>, %arg5: memref<128x128xf32, #tpu.memory_space<vmem>>, %arg6: memref<1x128xf32, #tpu.memory_space<vmem>>, %arg7: memref<8x128xf32, #tpu.memory_space<vmem>>) attributes {dimension_semantics = [#tpu.dimension_semantics<parallel>], iteration_bounds = array<i64: 2>, scalar_prefetch = 0 : i64, scratch_operands = 0 : i64, tpu.core_type = #tpu.core_type<tc>, window_params = [{transform_indices = @transform_0, window_bounds = array<i64: 8, 128>}, {pipeline_mode = #tpu.pipeline_mode<synchronous>, transform_indices = @transform_1, window_bounds = array<i64: 8, 8>}, {pipeline_mode = #tpu.pipeline_mode<synchronous>, transform_indices = @transform_2, window_bounds = array<i64: 128, 128>}, {pipeline_mode = #tpu.pipeline_mode<synchronous>, transform_indices = @transform_3, window_bounds = array<i64: 1, 128>}, {pipeline_mode = #tpu.pipeline_mode<synchronous>, transform_indices = @transform_4, window_bounds = array<i64: 128, 128>}, {pipeline_mode = #tpu.pipeline_mode<synchronous>, transform_indices = @transform_5, window_bounds = array<i64: 1, 128>}, {transform_indices = @transform_6, window_bounds = array<i64: 8, 128>}]} {
    %c0 = arith.constant 0 : index
    %c0_0 = arith.constant 0 : index
    %0 = vector.load %arg2[%c0, %c0_0] : memref<8x8xf32, #tpu.memory_space<vmem>>, vector<8x8xf32>
    %c0_1 = arith.constant 0 : index
    %c0_2 = arith.constant 0 : index
    %1 = vector.load %arg1[%c0_1, %c0_2] : memref<8x128xf32, #tpu.memory_space<vmem>>, vector<8x128xf32>
    %c0_3 = arith.constant 0 : index
    %c0_4 = arith.constant 0 : index
    %2 = vector.load %arg3[%c0_3, %c0_4] : memref<128x128xf32, #tpu.memory_space<vmem>>, vector<128x128xf32>
    %c0_5 = arith.constant 0 : index
    %c0_6 = arith.constant 0 : index
    %3 = vector.load %arg4[%c0_5, %c0_6] : memref<1x128xf32, #tpu.memory_space<vmem>>, vector<1x128xf32>
    %cst = arith.constant dense<0.000000e+00> : vector<8x128xf32>
    %4 = tpu.matmul %1, %2, %cst {dimension_numbers = #tpu.dot_dimension_numbers<[1], [0], [0], [1], [0, 0, 1, 1], [], []>} : vector<8x128xf32>, vector<128x128xf32>, vector<8x128xf32> -> vector<8x128xf32>
    %cst_7 = arith.constant dense<0.000000e+00> : vector<8x128xf32>
    %5 = tpu.matmul %0, %4, %cst_7 {dimension_numbers = #tpu.dot_dimension_numbers<[1], [0], [0], [1], [0, 0, 1, 1], [], []>} : vector<8x8xf32>, vector<8x128xf32>, vector<8x128xf32> -> vector<8x128xf32>
    %6 = vector.broadcast %3 : vector<1x128xf32> to vector<8x128xf32>
    %7 = arith.addf %5, %6 : vector<8x128xf32>
    %cst_8 = arith.constant 0.000000e+00 : f32
    %8 = vector.broadcast %cst_8 : f32 to vector<8x128xf32>
    %9 = arith.maximumf %7, %8 : vector<8x128xf32>
    %c0_9 = arith.constant 0 : index
    %c0_10 = arith.constant 0 : index
    %10 = vector.load %arg5[%c0_9, %c0_10] : memref<128x128xf32, #tpu.memory_space<vmem>>, vector<128x128xf32>
    %c0_11 = arith.constant 0 : index
    %c0_12 = arith.constant 0 : index
    %11 = vector.load %arg6[%c0_11, %c0_12] : memref<1x128xf32, #tpu.memory_space<vmem>>, vector<1x128xf32>
    %cst_13 = arith.constant dense<0.000000e+00> : vector<8x128xf32>
    %12 = tpu.matmul %9, %10, %cst_13 {dimension_numbers = #tpu.dot_dimension_numbers<[1], [0], [0], [1], [0, 0, 1, 1], [], []>} : vector<8x128xf32>, vector<128x128xf32>, vector<8x128xf32> -> vector<8x128xf32>
    %cst_14 = arith.constant dense<0.000000e+00> : vector<8x128xf32>
    %13 = tpu.matmul %0, %12, %cst_14 {dimension_numbers = #tpu.dot_dimension_numbers<[1], [0], [0], [1], [0, 0, 1, 1], [], []>} : vector<8x8xf32>, vector<8x128xf32>, vector<8x128xf32> -> vector<8x128xf32>
    %14 = vector.broadcast %11 : vector<1x128xf32> to vector<8x128xf32>
    %15 = arith.addf %13, %14 : vector<8x128xf32>
    %cst_15 = arith.constant 0.000000e+00 : f32
    %16 = vector.broadcast %cst_15 : f32 to vector<8x128xf32>
    %17 = arith.maximumf %15, %16 : vector<8x128xf32>
    %c0_16 = arith.constant 0 : index
    %c0_17 = arith.constant 0 : index
    %18 = vector.load %arg7[%c0_16, %c0_17] : memref<8x128xf32, #tpu.memory_space<vmem>>, vector<8x128xf32>
    tpu.vector_store %arg7[%c0_16, %c0_17], %17 {strides = array<i32>} : memref<8x128xf32, #tpu.memory_space<vmem>>, vector<8x128xf32>,
    return
  }
  func.func @transform_0(%arg0: i32) -> (i32, i32) {
    %c0_i32 = arith.constant 0 : i32
    %c0_i32_0 = arith.constant 0 : i32
    return %arg0, %c0_i32 : i32, i32
  }
  func.func @transform_1(%arg0: i32) -> (i32, i32) {
    %c0_i32 = arith.constant 0 : i32
    %c0_i32_0 = arith.constant 0 : i32
    %c0_i32_1 = arith.constant 0 : i32
    return %c0_i32, %c0_i32_0 : i32, i32
  }
  func.func @transform_2(%arg0: i32) -> (i32, i32) {
    %c0_i32 = arith.constant 0 : i32
    %c0_i32_0 = arith.constant 0 : i32
    %c0_i32_1 = arith.constant 0 : i32
    return %c0_i32, %c0_i32_0 : i32, i32
  }
  func.func @transform_3(%arg0: i32) -> (i32, i32) {
    %c0_i32 = arith.constant 0 : i32
    %c0_i32_0 = arith.constant 0 : i32
    %c0_i32_1 = arith.constant 0 : i32
    return %c0_i32, %c0_i32_0 : i32, i32
  }
  func.func @transform_4(%arg0: i32) -> (i32, i32) {
    %c0_i32 = arith.constant 0 : i32
    %c0_i32_0 = arith.constant 0 : i32
    %c0_i32_1 = arith.constant 0 : i32
    return %c0_i32, %c0_i32_0 : i32, i32
  }
  func.func @transform_5(%arg0: i32) -> (i32, i32) {
    %c0_i32 = arith.constant 0 : i32
    %c0_i32_0 = arith.constant 0 : i32
    %c0_i32_1 = arith.constant 0 : i32
    return %c0_i32, %c0_i32_0 : i32, i32
  }
  func.func @transform_6(%arg0: i32) -> (i32, i32) {
    %c0_i32 = arith.constant 0 : i32
    %c0_i32_0 = arith.constant 0 : i32
    return %arg0, %c0_i32 : i32, i32
  }
}

module attributes {stable_mosaic.version = 11 : i64} {
  func.func @kernel(%arg0: i32, %arg1: memref<8x1024xf32, #tpu.memory_space<vmem>>, %arg2: memref<1024x128xf32, #tpu.memory_space<vmem>>, %arg3: memref<1x128xf32, #tpu.memory_space<vmem>>, %arg4: memref<8x128xf32, #tpu.memory_space<vmem>>, %arg5: memref<8x128xf32, #tpu.memory_space<vmem>>) attributes {dimension_semantics = [#tpu.dimension_semantics<arbitrary>], iteration_bounds = array<i64: 1>, scalar_prefetch = 0 : i64, scratch_operands = 1 : i64, tpu.core_type = #tpu.core_type<tc>, window_params = [{transform_indices = @transform_0, window_bounds = array<i64: 8, 1024>}, {transform_indices = @transform_1, window_bounds = array<i64: 1024, 128>}, {pipeline_mode = #tpu.pipeline_mode<synchronous>, transform_indices = @transform_2, window_bounds = array<i64: 1, 128>}, {pipeline_mode = #tpu.pipeline_mode<synchronous>, transform_indices = @transform_3, window_bounds = array<i64: 8, 128>}]} {
    %c0_i32 = arith.constant 0 : i32
    %0 = arith.cmpi eq, %arg0, %c0_i32 : i32
    %1 = arith.extui %0 : i1 to i32
    %c0_i32_0 = arith.constant 0 : i32
    %2 = arith.cmpi ne, %1, %c0_i32_0 : i32
    scf.if %2 {
      %cst_10 = arith.constant 0.000000e+00 : f32
      %12 = vector.broadcast %cst_10 : f32 to vector<8x128xf32>
      %c0_11 = arith.constant 0 : index
      %c0_12 = arith.constant 0 : index
      %13 = vector.load %arg5[%c0_11, %c0_12] : memref<8x128xf32, #tpu.memory_space<vmem>>, vector<8x128xf32>
      tpu.vector_store %arg5[%c0_11, %c0_12], %12 {strides = array<i32>} : memref<8x128xf32, #tpu.memory_space<vmem>>, vector<8x128xf32>,
    } else {
    }
    %c0 = arith.constant 0 : index
    %c0_1 = arith.constant 0 : index
    %3 = vector.load %arg5[%c0, %c0_1] : memref<8x128xf32, #tpu.memory_space<vmem>>, vector<8x128xf32>
    %c0_2 = arith.constant 0 : index
    %c0_3 = arith.constant 0 : index
    %4 = vector.load %arg1[%c0_2, %c0_3] : memref<8x1024xf32, #tpu.memory_space<vmem>>, vector<8x1024xf32>
    %c0_4 = arith.constant 0 : index
    %c0_5 = arith.constant 0 : index
    %5 = vector.load %arg2[%c0_4, %c0_5] : memref<1024x128xf32, #tpu.memory_space<vmem>>, vector<1024x128xf32>
    %cst = arith.constant dense<0.000000e+00> : vector<8x128xf32>
    %6 = tpu.matmul %4, %5, %cst {dimension_numbers = #tpu.dot_dimension_numbers<[1], [0], [0], [1], [0, 0, 1, 1], [], []>} : vector<8x1024xf32>, vector<1024x128xf32>, vector<8x128xf32> -> vector<8x128xf32>
    %7 = arith.addf %3, %6 : vector<8x128xf32>
    %c0_6 = arith.constant 0 : index
    %c0_7 = arith.constant 0 : index
    %8 = vector.load %arg5[%c0_6, %c0_7] : memref<8x128xf32, #tpu.memory_space<vmem>>, vector<8x128xf32>
    tpu.vector_store %arg5[%c0_6, %c0_7], %7 {strides = array<i32>} : memref<8x128xf32, #tpu.memory_space<vmem>>, vector<8x128xf32>,
    %c0_i32_8 = arith.constant 0 : i32
    %9 = arith.cmpi eq, %arg0, %c0_i32_8 : i32
    %10 = arith.extui %9 : i1 to i32
    %c0_i32_9 = arith.constant 0 : i32
    %11 = arith.cmpi ne, %10, %c0_i32_9 : i32
    scf.if %11 {
      %c0_10 = arith.constant 0 : index
      %c0_11 = arith.constant 0 : index
      %12 = vector.load %arg5[%c0_10, %c0_11] : memref<8x128xf32, #tpu.memory_space<vmem>>, vector<8x128xf32>
      %c0_12 = arith.constant 0 : index
      %c0_13 = arith.constant 0 : index
      %13 = vector.load %arg3[%c0_12, %c0_13] : memref<1x128xf32, #tpu.memory_space<vmem>>, vector<1x128xf32>
      %14 = vector.broadcast %13 : vector<1x128xf32> to vector<8x128xf32>
      %15 = arith.addf %12, %14 : vector<8x128xf32>
      %c0_14 = arith.constant 0 : index
      %c0_15 = arith.constant 0 : index
      %16 = vector.load %arg4[%c0_14, %c0_15] : memref<8x128xf32, #tpu.memory_space<vmem>>, vector<8x128xf32>
      tpu.vector_store %arg4[%c0_14, %c0_15], %15 {strides = array<i32>} : memref<8x128xf32, #tpu.memory_space<vmem>>, vector<8x128xf32>,
    } else {
    }
    return
  }
  func.func @transform_0(%arg0: i32) -> (i32, i32) {
    %c0_i32 = arith.constant 0 : i32
    %c0_i32_0 = arith.constant 0 : i32
    return %c0_i32, %arg0 : i32, i32
  }
  func.func @transform_1(%arg0: i32) -> (i32, i32) {
    %c0_i32 = arith.constant 0 : i32
    %c0_i32_0 = arith.constant 0 : i32
    return %arg0, %c0_i32 : i32, i32
  }
  func.func @transform_2(%arg0: i32) -> (i32, i32) {
    %c0_i32 = arith.constant 0 : i32
    %c0_i32_0 = arith.constant 0 : i32
    %c0_i32_1 = arith.constant 0 : i32
    return %c0_i32, %c0_i32_0 : i32, i32
  }
  func.func @transform_3(%arg0: i32) -> (i32, i32) {
    %c0_i32 = arith.constant 0 : i32
    %c0_i32_0 = arith.constant 0 : i32
    %c0_i32_1 = arith.constant 0 : i32
    return %c0_i32, %c0_i32_0 : i32, i32
  }
}

</mosaic_0001>

<bundles_post_ra>
// kernel: _lambda_.3
= control target key start
LH: loop header
LB: loop body
LE: loop exit
PB: predicated region body
PF: predicated region fallthrough
CT: control target
= control target key end

     0   :  { %vm9_vm0 = vcmask 64512   ;;  %v49_v5 = vlaneseq  ;;  %s80_s0 = inlined_call_operand.vmem [shape: f32[8,8], index: 0, kind: input, shape index: {}]   ;;  %s81_s1 = inlined_call_operand.vmem [shape: f32[8,8], index: 1, kind: output, shape index: {}]  }
   0x1   :  { %v8_v0 = vld [vmem:[%s80_s0] sm:$0xff] }
   0x2   :  { %v10_v1 = vsel %vm9_vm0, %v8_v0, 0.0  ;;  %v50_v6 = vshrl.u32 %v49_v5, 7 }
   0x3   :  { %11 = vadd.xlane.f32.xlu0 %v10_v1 }
   0x4   :  { %v51_v7 = vsub.s32 0, %v50_v6 }
  0x8c   :  { %v12_v2 = vpop.xlane.xlu0 %11 }
  0x8d   :  { %vm13_vm1 = vcmp.eq.f32.partialorder %v12_v2, 0.0 }
  0x8e   :  { %v14_v3 = vsel %vm13_vm1, 1.0, %v12_v2 }
  0x8f   :  { %60 = vrsqrt.f32 %v14_v3 }
  0x9c   :  { %v61_v4 = vpop.eup %60 }
  0x9d   :  { %17 = vxpose.xlu0.b32.start.end [1/1] (short) (narrow) %v61_v4, 8  ;;  %v16_v9 = vmul.f32 %v61_v4, %v8_v0 }
 0x119   :  { %v33_v8 = vpop.trf.xlu0 }
 0x11a   :  { %v52_v10 = vrot.slane %v33_v8, %v51_v7 }
 0x11c   :  { %v53_v11 = vmul.f32 %v52_v10, %v16_v9 }
 0x11e   :  { %54 = vst.msk [vmem:[%s81_s1] sm:$0xff] %vm9_vm0, %v53_v11 }

// kernel: _lambda_.4
= control target key start
LH: loop header
LB: loop body
LE: loop exit
PB: predicated region body
PF: predicated region fallthrough
CT: control target
= control target key end

     0   :  { %s821_s21 = smov 0   ;;  %s1002_s0 = inlined_call_operand.vmem [shape: f32[16,128], index: 0, kind: input, shape index: {}]   ;;  %s1003_s1 = inlined_call_operand.vmem [shape: f32[8,8], index: 1, kind: input, shape index: {}]   ;;  %s1004_s2 = inlined_call_operand.vmem [shape: f32[128,128], index: 2, kind: input, shape index: {}]   ;;  %s1005_s3 = inlined_call_operand.vmem [shape: f32[1,128], index: 3, kind: input, shape index: {}]   ;;  %s1006_s4 = inlined_call_operand.vmem [shape: f32[128,128], index: 4, kind: input, shape index: {}]   ;;  %s1007_s5 = inlined_call_operand.vmem [shape: f32[1,128], index: 5, kind: input, shape index: {}]   ;;  %s1008_s6 = inlined_call_operand.vmem [shape: f32[16,128], index: 6, kind: output, shape index: {}]  }
   0x1 LB: > { %s635_s22 = sadd.s32 4294967295, %s782_s21   ;;  %p639_p0 = scmp.ge.s32.totalorder %s782_s21, 1  ;;  %s782_s21 = sphi %s821_s21, %s16_s21  }
   0x2   : > { %p211_p1 = scmp.lt.s32.totalorder %s782_s21, 3 }
   0x4   : > { %p212_p2 = pnand %p639_p0, %p211_p1 }
   0x5   : > { %p239_p3 = scmp.lt.s32.totalorder (!%p212_p2), %s635_s22, 1 }
   0x6   : > { %215 = sbr.rel (%p212_p2) target bundleno = 827 (0x33b), region = 44 }
   0xb   : > { %v264_v0 = vld [vmem:[%s1004_s2 + $0x78] sm:$0xff]  ;;  %v784_v1 = vmov 0.0   ;;  %v263_v2 = vld [vmem:[%s1004_s2 + $0x70] sm:$0xff]  ;;  %vm785_vm0 = vmmov 0   ;;  %v262_v3 = vld [vmem:[%s1004_s2 + $0x68] sm:$0xff]  ;;  %s1010_s22 = smov (!%p239_p3, %s635_s22), 1 }
   0xc   : > { %686 = vmatprep.subr.mxu0 %v784_v1  ;;  %718 = vmatprep.mubr.msk.f32.mxu0 %vm785_vm0, %v784_v1  ;;  %v261_v4 = vld [vmem:[%s1004_s2 + $0x60] sm:$0xff]  ;;  %v260_v5 = vld [vmem:[%s1004_s2 + $0x58] sm:$0xff]  ;;  %v259_v6 = vld [vmem:[%s1004_s2 + $0x50] sm:$0xff]  ;;  %s640_s27 = sshll.u32 %s1010_s22, 3  ;;  %vm342_vm1 = vcmask 64512  }
   0xd   : > { %687 = vmatpush3.msra.mxu0 %v264_v0  ;;  %721 = vmatprep.subr.mxu1 %v784_v1  ;;  %v258_v7 = vld [vmem:[%s1004_s2 + $0x48] sm:$0xff]  ;;  %v257_v8 = vld [vmem:[%s1004_s2 + $0x40] sm:$0xff]  ;;  %v256_v9 = vld [vmem:[%s1004_s2 + $0x38] sm:$0xff]  ;;  %s242_s10 = scalar_lea.vmem %s1002_s0, %s640_s27  ;;  %s246_s11 = scalar_lea.vmem %s1008_s6, %s640_s27 }
   0xe   : > { %688 = vmatprep.subr.mxu0 %v784_v1  ;;  %723 = vmatprep.mubr.msk.f32.mxu1 %vm785_vm0, %v784_v1  ;;  %v255_v10 = vld [vmem:[%s1004_s2 + $0x30] sm:$0xff]  ;;  %v254_v11 = vld [vmem:[%s1004_s2 + $0x28] sm:$0xff]  ;;  %v253_v12 = vld [vmem:[%s1004_s2 + $0x20] sm:$0xff] }
   0xf   : > { %689 = vmatpush3.msra.mxu0 %v263_v2  ;;  %v252_v13 = vld [vmem:[%s1004_s2 + $0x18] sm:$0xff]  ;;  %v251_v14 = vld [vmem:[%s1004_s2 + $0x10] sm:$0xff]  ;;  %v250_v15 = vld [vmem:[%s1004_s2 + $0x8] sm:$0xff] }
  0x10   : > { %690 = vmatprep.subr.mxu0 %v784_v1  ;;  %v249_v16 = vld [vmem:[%s1004_s2] sm:$0xff]  ;;  %v432_v20 = vld [vmem:[%s1006_s4 + $0x78] sm:$0xff]  ;;  %v431_v22 = vld [vmem:[%s1006_s4 + $0x70] sm:$0xff] }
  0x11   : > { %691 = vmatpush3.msra.mxu0 %v262_v3  ;;  %v248_v17 = vld [vmem:[%s242_s10] sm:$0xff]  ;;  %v430_v23 = vld [vmem:[%s1006_s4 + $0x68] sm:$0xff]  ;;  %v428_v25 = vld [vmem:[%s1006_s4 + $0x58] sm:$0xff] }
  0x12   : > { %692 = vmatprep.subr.mxu0 %v784_v1  ;;  %v916_v18 = vld [vmem:[%s1003_s1] sm:$0xff]  ;;  %v427_v26 = vld [vmem:[%s1006_s4 + $0x50] sm:$0xff]  ;;  %v426_v27 = vld [vmem:[%s1006_s4 + $0x48] sm:$0xff] }
  0x13   : > { %693 = vmatpush3.msra.mxu0 %v261_v4  ;;  %v429_v24 = vld [vmem:[%s1006_s4 + $0x60] sm:$0xff]  ;;  %v424_v29 = vld [vmem:[%s1006_s4 + $0x38] sm:$0xff]  ;;  %v423_v30 = vld [vmem:[%s1006_s4 + $0x30] sm:$0xff] }
  0x14   : > { %694 = vmatprep.subr.mxu0 %v784_v1  ;;  %v425_v28 = vld [vmem:[%s1006_s4 + $0x40] sm:$0xff]  ;;  %v422_v31 = vld [vmem:[%s1006_s4 + $0x28] sm:$0xff]  ;;  %v420_v33 = vld [vmem:[%s1006_s4 + $0x18] sm:$0xff] }
  0x15   : > { %695 = vmatpush3.msra.mxu0 %v260_v5  ;;  %v421_v32 = vld [vmem:[%s1006_s4 + $0x20] sm:$0xff]  ;;  %v419_v34 = vld [vmem:[%s1006_s4 + $0x10] sm:$0xff]  ;;  %v418_v35 = vld [vmem:[%s1006_s4 + $0x8] sm:$0xff] }
  0x16   : > { %696 = vmatprep.subr.mxu0 %v784_v1  ;;  %v417_v36 = vld [vmem:[%s1006_s4] sm:$0xff] }
  0x17   : > { %697 = vmatpush3.msra.mxu0 %v259_v6  ;;  %v642_v37 = vld [vmem:[%s1005_s3] ss:$0 sm:$0xff] }
  0x18   : > { %698 = vmatprep.subr.mxu0 %v784_v1  ;;  %v644_v44 = vld [vmem:[%s1007_s5] ss:$0 sm:$0xff] }
  0x19   : > { %699 = vmatpush3.msra.mxu0 %v258_v7 }
  0x1a   : > { %700 = vmatprep.subr.mxu0 %v784_v1 }
  0x1b   : > { %701 = vmatpush3.msra.mxu0 %v257_v8 }
  0x1c   : > { %702 = vmatprep.subr.mxu0 %v784_v1 }
  0x1d   : > { %703 = vmatpush3.msra.mxu0 %v256_v9 }
  0x1e   : > { %704 = vmatprep.subr.mxu0 %v784_v1 }
  0x1f   : > { %705 = vmatpush3.msra.mxu0 %v255_v10 }
  0x20   : > { %706 = vmatprep.subr.mxu0 %v784_v1 }
  0x21   : > { %707 = vmatpush3.msra.mxu0 %v254_v11 }
  0x22   : > { %708 = vmatprep.subr.mxu0 %v784_v1 }
  0x23   : > { %709 = vmatpush3.msra.mxu0 %v253_v12 }
  0x24   : > { %710 = vmatprep.subr.mxu0 %v784_v1 }
  0x25   : > { %711 = vmatpush3.msra.mxu0 %v252_v13 }
  0x26   : > { %712 = vmatprep.subr.mxu0 %v784_v1 }
  0x27   : > { %713 = vmatpush3.msra.mxu0 %v251_v14 }
  0x28   : > { %714 = vmatprep.subr.mxu0 %v784_v1 }
  0x29   : > { %715 = vmatpush3.msra.mxu0 %v250_v15 }
  0x2a   : > { %716 = vmatprep.subr.mxu0 %v784_v1 }
  0x2b   : > { %717 = vmatpush3.msra.mxu0 %v249_v16 }
  0x2c   : > { %719 = vmatmul.mubr.f32.vlgmr.msra.gmra.mxu0 %v248_v17  ;;  %761 = vmatprep.subr.mxu0 %v784_v1 }
  0x2d   : > { %763 = vmatprep.mubr.msk.f32.mxu0 %vm785_vm0, %v784_v1 }
  0xec   : > { %v332_v19 = vpop.f32.mrf.mxu0 }
  0xed   : > { %722 = vmatpush3.msra.mxu1 %v332_v19 }
  0xee   : > { %v720_v21 = vpop.f32.mrf.mxu0  ;;  %724 = vmatmul.mubr.msk.f32.vlgmr.msra.gmra.mxu1 %vm342_vm1, %v916_v18  ;;  %726 = vmatprep.subr.mxu1 %v784_v1 }
  0xef   : > { %727 = vmatpush3.msra.mxu1 %v432_v20  ;;  %758 = vmatprep.mubr.msk.f32.mxu1 %vm785_vm0, %v784_v1 }
  0xf0   : > { %728 = vmatprep.subr.mxu1 %v784_v1 }
  0xf1   : > { %729 = vmatpush3.msra.mxu1 %v431_v22 }
  0xf2   : > { %730 = vmatprep.subr.mxu1 %v784_v1 }
  0xf3   : > { %731 = vmatpush3.msra.mxu1 %v430_v23 }
  0xf4   : > { %732 = vmatprep.subr.mxu1 %v784_v1 }
  0xf5   : > { %733 = vmatpush3.msra.mxu1 %v429_v24 }
  0xf6   : > { %734 = vmatprep.subr.mxu1 %v784_v1 }
  0xf7   : > { %735 = vmatpush3.msra.mxu1 %v428_v25 }
  0xf8   : > { %736 = vmatprep.subr.mxu1 %v784_v1 }
  0xf9   : > { %737 = vmatpush3.msra.mxu1 %v427_v26 }
  0xfa   : > { %738 = vmatprep.subr.mxu1 %v784_v1 }
  0xfb   : > { %739 = vmatpush3.msra.mxu1 %v426_v27 }
  0xfc   : > { %740 = vmatprep.subr.mxu1 %v784_v1 }
  0xfd   : > { %741 = vmatpush3.msra.mxu1 %v425_v28 }
  0xfe   : > { %742 = vmatprep.subr.mxu1 %v784_v1 }
  0xff   : > { %743 = vmatpush3.msra.mxu1 %v424_v29 }
 0x100   : > { %744 = vmatprep.subr.mxu1 %v784_v1 }
 0x101   : > { %745 = vmatpush3.msra.mxu1 %v423_v30 }
 0x102   : > { %746 = vmatprep.subr.mxu1 %v784_v1 }
 0x103   : > { %747 = vmatpush3.msra.mxu1 %v422_v31 }
 0x104   : > { %748 = vmatprep.subr.mxu1 %v784_v1 }
 0x105   : > { %749 = vmatpush3.msra.mxu1 %v421_v32 }
 0x106   : > { %750 = vmatprep.subr.mxu1 %v784_v1 }
 0x107   : > { %751 = vmatpush3.msra.mxu1 %v420_v33 }
 0x108   : > { %752 = vmatprep.subr.mxu1 %v784_v1 }
 0x109   : > { %753 = vmatpush3.msra.mxu1 %v419_v34 }
 0x10a   : > { %754 = vmatprep.subr.mxu1 %v784_v1 }
 0x10b   : > { %755 = vmatpush3.msra.mxu1 %v418_v35 }
 0x10c   : > { %756 = vmatprep.subr.mxu1 %v784_v1 }
 0x10d   : > { %757 = vmatpush3.msra.mxu1 %v417_v36 }
 0x1ae   : > { %v412_v38 = vpop.f32.mrf.mxu1 }
 0x1af   : > { %v413_v39 = vadd.f32 %v642_v37, %v412_v38 }
 0x1b0   : > { %v725_v40 = vpop.f32.mrf.mxu1 }
 0x1b1   : > { %v416_v41 = vmax.f32 %v413_v39, 0.0 }
 0x1b3   : > { %759 = vmatmul.mubr.f32.vlgmr.msra.gmra.mxu1 %v416_v41 }
 0x273   : > { %v500_v42 = vpop.f32.mrf.mxu1 }
 0x274   : > { %762 = vmatpush3.msra.mxu0 %v500_v42 }
 0x275   : > { %v760_v43 = vpop.f32.mrf.mxu1  ;;  %764 = vmatmul.mubr.msk.f32.vlgmr.msra.gmra.mxu0 %vm342_vm1, %v916_v18 }
 0x335   : > { %v576_v45 = vpop.f32.mrf.mxu0 }
 0x336   : > { %v577_v46 = vadd.f32 %v644_v44, %v576_v45 }
 0x337   : > { %v765_v47 = vpop.f32.mrf.mxu0 }
 0x338   : > { %v580_v48 = vmax.f32 %v577_v46, 0.0 }
 0x33a   : > { %581 = vst [vmem:[%s246_s11] sm:$0xff] %v580_v48 }
 0x33b PF: > { %s16_s21 = sadd.s32 1, %s782_s21  }
 0x33c   : > { %p13_p4 = scmp.ge.s32.totalorder %s16_s21, 4  }
 0x33e   :  { %15 = sbr.rel (!%p13_p4) target bundleno = 1 (0x1), region = 74 }

// kernel: _lambda_.5
= control target key start
LH: loop header
LB: loop body
LE: loop exit
PB: predicated region body
PF: predicated region fallthrough
CT: control target
= control target key end

     0   :  { %s1030_s1 = inlined_call_operand.vmem [shape: f32[1024,128], index: 1, kind: input, shape index: {}]   ;;  %s1031_s0 = inlined_call_operand.vmem [shape: f32[8,1024], index: 0, kind: input, shape index: {}]   ;;  %s1032_s2 = inlined_call_operand.vmem [shape: f32[1,128], index: 2, kind: input, shape index: {}]   ;;  %s1033_s3 = inlined_call_operand.vmem [shape: f32[8,128], index: 3, kind: output, shape index: {}]  }
   0x1   :  { %v59_v0 = vld [vmem:[%s1030_s1 + $0xf8] sm:$0xff]  ;;  %v58_v4 = vld [vmem:[%s1030_s1 + $0xf0] sm:$0xff]  ;;  %v57_v8 = vld [vmem:[%s1030_s1 + $0xe8] sm:$0xff] }
   0x2   :  { %v91_v1 = vld [vmem:[%s1030_s1 + $0x1f8] sm:$0xff]  ;;  %456 = vmatprep.subr.mxu0 %v59_v0  ;;  %v90_v5 = vld [vmem:[%s1030_s1 + $0x1f0] sm:$0xff]  ;;  %v89_v9 = vld [vmem:[%s1030_s1 + $0x1e8] sm:$0xff] }
   0x3   :  { %v43_v2 = vld [vmem:[%s1030_s1 + $0x78] sm:$0xff]  ;;  %491 = vmatprep.subr.mxu1 %v91_v1  ;;  %v42_v6 = vld [vmem:[%s1030_s1 + $0x70] sm:$0xff]  ;;  %v41_v10 = vld [vmem:[%s1030_s1 + $0x68] sm:$0xff] }
   0x4   :  { %v75_v3 = vld [vmem:[%s1030_s1 + $0x178] sm:$0xff]  ;;  %457 = vmatpush3.msra.mxu0 %v43_v2  ;;  %v74_v7 = vld [vmem:[%s1030_s1 + $0x170] sm:$0xff]  ;;  %v73_v11 = vld [vmem:[%s1030_s1 + $0x168] sm:$0xff] }
   0x5   :  { %492 = vmatpush3.msra.mxu1 %v75_v3  ;;  %458 = vmatprep.subr.mxu0 %v58_v4  ;;  %v56_v12 = vld [vmem:[%s1030_s1 + $0xe0] sm:$0xff]  ;;  %v55_v16 = vld [vmem:[%s1030_s1 + $0xd8] sm:$0xff]  ;;  %v54_v20 = vld [vmem:[%s1030_s1 + $0xd0] sm:$0xff] }
   0x6   :  { %493 = vmatprep.subr.mxu1 %v90_v5  ;;  %459 = vmatpush3.msra.mxu0 %v42_v6  ;;  %v88_v13 = vld [vmem:[%s1030_s1 + $0x1e0] sm:$0xff]  ;;  %v87_v17 = vld [vmem:[%s1030_s1 + $0x1d8] sm:$0xff]  ;;  %v86_v21 = vld [vmem:[%s1030_s1 + $0x1d0] sm:$0xff] }
   0x7   :  { %494 = vmatpush3.msra.mxu1 %v74_v7  ;;  %460 = vmatprep.subr.mxu0 %v57_v8  ;;  %v40_v14 = vld [vmem:[%s1030_s1 + $0x60] sm:$0xff]  ;;  %v39_v18 = vld [vmem:[%s1030_s1 + $0x58] sm:$0xff]  ;;  %v38_v22 = vld [vmem:[%s1030_s1 + $0x50] sm:$0xff] }
   0x8   :  { %495 = vmatprep.subr.mxu1 %v89_v9  ;;  %v72_v15 = vld [vmem:[%s1030_s1 + $0x160] sm:$0xff]  ;;  %461 = vmatpush3.msra.mxu0 %v41_v10  ;;  %v71_v19 = vld [vmem:[%s1030_s1 + $0x158] sm:$0xff]  ;;  %v70_v23 = vld [vmem:[%s1030_s1 + $0x150] sm:$0xff] }
   0x9   :  { %496 = vmatpush3.msra.mxu1 %v73_v11  ;;  %462 = vmatprep.subr.mxu0 %v56_v12  ;;  %v53_v24 = vld [vmem:[%s1030_s1 + $0xc8] sm:$0xff]  ;;  %v52_v28 = vld [vmem:[%s1030_s1 + $0xc0] sm:$0xff]  ;;  %v51_v32 = vld [vmem:[%s1030_s1 + $0xb8] sm:$0xff] }
   0xa   :  { %497 = vmatprep.subr.mxu1 %v88_v13  ;;  %463 = vmatpush3.msra.mxu0 %v40_v14  ;;  %v85_v25 = vld [vmem:[%s1030_s1 + $0x1c8] sm:$0xff]  ;;  %v84_v29 = vld [vmem:[%s1030_s1 + $0x1c0] sm:$0xff]  ;;  %v83_v33 = vld [vmem:[%s1030_s1 + $0x1b8] sm:$0xff] }
   0xb   :  { %498 = vmatpush3.msra.mxu1 %v72_v15  ;;  %464 = vmatprep.subr.mxu0 %v55_v16  ;;  %v37_v26 = vld [vmem:[%s1030_s1 + $0x48] sm:$0xff]  ;;  %v36_v30 = vld [vmem:[%s1030_s1 + $0x40] sm:$0xff]  ;;  %v35_v34 = vld [vmem:[%s1030_s1 + $0x38] sm:$0xff] }
   0xc   :  { %499 = vmatprep.subr.mxu1 %v87_v17  ;;  %465 = vmatpush3.msra.mxu0 %v39_v18  ;;  %v69_v27 = vld [vmem:[%s1030_s1 + $0x148] sm:$0xff]  ;;  %v68_v31 = vld [vmem:[%s1030_s1 + $0x140] sm:$0xff]  ;;  %v67_v35 = vld [vmem:[%s1030_s1 + $0x138] sm:$0xff] }
   0xd   :  { %500 = vmatpush3.msra.mxu1 %v71_v19  ;;  %466 = vmatprep.subr.mxu0 %v54_v20  ;;  %v50_v36 = vld [vmem:[%s1030_s1 + $0xb0] sm:$0xff]  ;;  %v49_v40 = vld [vmem:[%s1030_s1 + $0xa8] sm:$0xff]  ;;  %v48_v44 = vld [vmem:[%s1030_s1 + $0xa0] sm:$0xff] }
   0xe   :  { %501 = vmatprep.subr.mxu1 %v86_v21  ;;  %467 = vmatpush3.msra.mxu0 %v38_v22  ;;  %v82_v37 = vld [vmem:[%s1030_s1 + $0x1b0] sm:$0xff]  ;;  %v81_v41 = vld [vmem:[%s1030_s1 + $0x1a8] sm:$0xff]  ;;  %v80_v45 = vld [vmem:[%s1030_s1 + $0x1a0] sm:$0xff] }
   0xf   :  { %502 = vmatpush3.msra.mxu1 %v70_v23  ;;  %468 = vmatprep.subr.mxu0 %v53_v24  ;;  %v34_v38 = vld [vmem:[%s1030_s1 + $0x30] sm:$0xff]  ;;  %v33_v42 = vld [vmem:[%s1030_s1 + $0x28] sm:$0xff]  ;;  %v32_v46 = vld [vmem:[%s1030_s1 + $0x20] sm:$0xff] }
  0x10   :  { %503 = vmatprep.subr.mxu1 %v85_v25  ;;  %469 = vmatpush3.msra.mxu0 %v37_v26  ;;  %v66_v39 = vld [vmem:[%s1030_s1 + $0x130] sm:$0xff]  ;;  %v65_v43 = vld [vmem:[%s1030_s1 + $0x128] sm:$0xff]  ;;  %v64_v47 = vld [vmem:[%s1030_s1 + $0x120] sm:$0xff] }
  0x11   :  { %504 = vmatpush3.msra.mxu1 %v69_v27  ;;  %470 = vmatprep.subr.mxu0 %v52_v28  ;;  %v47_v48 = vld [vmem:[%s1030_s1 + $0x98] sm:$0xff]  ;;  %v46_v52 = vld [vmem:[%s1030_s1 + $0x90] sm:$0xff]  ;;  %v45_v56 = vld [vmem:[%s1030_s1 + $0x88] sm:$0xff] }
  0x12   :  { %505 = vmatprep.subr.mxu1 %v84_v29  ;;  %471 = vmatpush3.msra.mxu0 %v36_v30  ;;  %v79_v49 = vld [vmem:[%s1030_s1 + $0x198] sm:$0xff]  ;;  %v78_v53 = vld [vmem:[%s1030_s1 + $0x190] sm:$0xff]  ;;  %v77_v57 = vld [vmem:[%s1030_s1 + $0x188] sm:$0xff] }
  0x13   :  { %506 = vmatpush3.msra.mxu1 %v68_v31  ;;  %472 = vmatprep.subr.mxu0 %v51_v32  ;;  %v31_v50 = vld [vmem:[%s1030_s1 + $0x18] sm:$0xff]  ;;  %v30_v54 = vld [vmem:[%s1030_s1 + $0x10] sm:$0xff]  ;;  %v29_v58 = vld [vmem:[%s1030_s1 + $0x8] sm:$0xff] }
  0x14   :  { %507 = vmatprep.subr.mxu1 %v83_v33  ;;  %473 = vmatpush3.msra.mxu0 %v35_v34  ;;  %v63_v51 = vld [vmem:[%s1030_s1 + $0x118] sm:$0xff]  ;;  %v62_v55 = vld [vmem:[%s1030_s1 + $0x110] sm:$0xff]  ;;  %v61_v59 = vld [vmem:[%s1030_s1 + $0x108] sm:$0xff] }
  0x15   :  { %508 = vmatpush3.msra.mxu1 %v67_v35  ;;  %474 = vmatprep.subr.mxu0 %v50_v36  ;;  %v44_v60 = vld [vmem:[%s1030_s1 + $0x80] sm:$0xff]  ;;  %v21_v63 = vld [vmem:[%s1031_s0 + $0x8] sm:$0xff]  ;;  %v23_v1 = vld [vmem:[%s1031_s0 + $0x18] sm:$0xff] }
  0x16   :  { %509 = vmatprep.subr.mxu1 %v82_v37  ;;  %475 = vmatpush3.msra.mxu0 %v34_v38  ;;  %v76_v61 = vld [vmem:[%s1030_s1 + $0x180] sm:$0xff]  ;;  %v22_v3 = vld [vmem:[%s1031_s0 + $0x10] sm:$0xff]  ;;  %v123_v4 = vld [vmem:[%s1030_s1 + $0x2f8] sm:$0xff] }
  0x17   :  { %510 = vmatpush3.msra.mxu1 %v66_v39  ;;  %476 = vmatprep.subr.mxu0 %v49_v40  ;;  %v28_v62 = vld [vmem:[%s1030_s1] sm:$0xff]  ;;  %v155_v5 = vld [vmem:[%s1030_s1 + $0x3f8] sm:$0xff]  ;;  %v122_v8 = vld [vmem:[%s1030_s1 + $0x2f0] sm:$0xff] }
  0x18   :  { %511 = vmatprep.subr.mxu1 %v81_v41  ;;  %477 = vmatpush3.msra.mxu0 %v33_v42  ;;  %v60_v0 = vld [vmem:[%s1030_s1 + $0x100] sm:$0xff]  ;;  %v107_v6 = vld [vmem:[%s1030_s1 + $0x278] sm:$0xff]  ;;  %v154_v9 = vld [vmem:[%s1030_s1 + $0x3f0] sm:$0xff] }
  0x19   :  { %512 = vmatpush3.msra.mxu1 %v65_v43  ;;  %478 = vmatprep.subr.mxu0 %v48_v44  ;;  %v20_v2 = vld [vmem:[%s1031_s0] sm:$0xff]  ;;  %v139_v7 = vld [vmem:[%s1030_s1 + $0x378] sm:$0xff]  ;;  %v106_v10 = vld [vmem:[%s1030_s1 + $0x270] sm:$0xff] }
  0x1a   :  { %513 = vmatprep.subr.mxu1 %v80_v45  ;;  %479 = vmatpush3.msra.mxu0 %v32_v46  ;;  %v138_v11 = vld [vmem:[%s1030_s1 + $0x370] sm:$0xff]  ;;  %v121_v12 = vld [vmem:[%s1030_s1 + $0x2e8] sm:$0xff]  ;;  %v120_v16 = vld [vmem:[%s1030_s1 + $0x2e0] sm:$0xff] }
  0x1b   :  { %514 = vmatpush3.msra.mxu1 %v64_v47  ;;  %480 = vmatprep.subr.mxu0 %v47_v48  ;;  %v153_v13 = vld [vmem:[%s1030_s1 + $0x3e8] sm:$0xff]  ;;  %v152_v17 = vld [vmem:[%s1030_s1 + $0x3e0] sm:$0xff]  ;;  %v119_v20 = vld [vmem:[%s1030_s1 + $0x2d8] sm:$0xff] }
  0x1c   :  { %515 = vmatprep.subr.mxu1 %v79_v49  ;;  %481 = vmatpush3.msra.mxu0 %v31_v50  ;;  %v105_v14 = vld [vmem:[%s1030_s1 + $0x268] sm:$0xff]  ;;  %v104_v18 = vld [vmem:[%s1030_s1 + $0x260] sm:$0xff]  ;;  %v151_v21 = vld [vmem:[%s1030_s1 + $0x3d8] sm:$0xff] }
  0x1d   :  { %516 = vmatpush3.msra.mxu1 %v63_v51  ;;  %482 = vmatprep.subr.mxu0 %v46_v52  ;;  %v137_v15 = vld [vmem:[%s1030_s1 + $0x368] sm:$0xff]  ;;  %v136_v19 = vld [vmem:[%s1030_s1 + $0x360] sm:$0xff]  ;;  %v103_v22 = vld [vmem:[%s1030_s1 + $0x258] sm:$0xff] }
  0x1e   :  { %517 = vmatprep.subr.mxu1 %v78_v53  ;;  %483 = vmatpush3.msra.mxu0 %v30_v54  ;;  %v135_v23 = vld [vmem:[%s1030_s1 + $0x358] sm:$0xff]  ;;  %v118_v24 = vld [vmem:[%s1030_s1 + $0x2d0] sm:$0xff]  ;;  %v117_v28 = vld [vmem:[%s1030_s1 + $0x2c8] sm:$0xff] }
  0x1f   :  { %518 = vmatpush3.msra.mxu1 %v62_v55  ;;  %484 = vmatprep.subr.mxu0 %v45_v56  ;;  %v150_v25 = vld [vmem:[%s1030_s1 + $0x3d0] sm:$0xff]  ;;  %v149_v29 = vld [vmem:[%s1030_s1 + $0x3c8] sm:$0xff]  ;;  %v116_v32 = vld [vmem:[%s1030_s1 + $0x2c0] sm:$0xff] }
  0x20   :  { %519 = vmatprep.subr.mxu1 %v77_v57  ;;  %485 = vmatpush3.msra.mxu0 %v29_v58  ;;  %v102_v26 = vld [vmem:[%s1030_s1 + $0x250] sm:$0xff]  ;;  %v101_v30 = vld [vmem:[%s1030_s1 + $0x248] sm:$0xff]  ;;  %v148_v33 = vld [vmem:[%s1030_s1 + $0x3c0] sm:$0xff] }
  0x21   :  { %520 = vmatpush3.msra.mxu1 %v61_v59  ;;  %486 = vmatprep.subr.mxu0 %v44_v60  ;;  %v134_v27 = vld [vmem:[%s1030_s1 + $0x350] sm:$0xff]  ;;  %v133_v31 = vld [vmem:[%s1030_s1 + $0x348] sm:$0xff]  ;;  %v100_v34 = vld [vmem:[%s1030_s1 + $0x240] sm:$0xff] }
  0x22   :  { %521 = vmatprep.subr.mxu1 %v76_v61  ;;  %487 = vmatpush3.msra.mxu0 %v28_v62  ;;  %v132_v35 = vld [vmem:[%s1030_s1 + $0x340] sm:$0xff]  ;;  %v115_v36 = vld [vmem:[%s1030_s1 + $0x2b8] sm:$0xff]  ;;  %v114_v40 = vld [vmem:[%s1030_s1 + $0x2b0] sm:$0xff] }
  0x23   :  { %220 = vmatprep.mubr.f32.mxu0 %v21_v63  ;;  %522 = vmatpush3.msra.mxu1 %v60_v0  ;;  %v147_v37 = vld [vmem:[%s1030_s1 + $0x3b8] sm:$0xff]  ;;  %v146_v41 = vld [vmem:[%s1030_s1 + $0x3b0] sm:$0xff]  ;;  %v113_v44 = vld [vmem:[%s1030_s1 + $0x2a8] sm:$0xff] }
  0x24   :  { %290 = vmatprep.mubr.f32.mxu1 %v23_v1  ;;  %221 = vmatmul.mubr.f32.vlgmr.msra.gmra.mxu0 %v20_v2  ;;  %v99_v38 = vld [vmem:[%s1030_s1 + $0x238] sm:$0xff]  ;;  %v98_v42 = vld [vmem:[%s1030_s1 + $0x230] sm:$0xff]  ;;  %v145_v45 = vld [vmem:[%s1030_s1 + $0x3a8] sm:$0xff] }
  0x25   :  { %291 = vmatmul.mubr.f32.vlgmr.msra.gmra.mxu1 %v22_v3  ;;  %526 = vmatprep.subr.mxu0 %v123_v4  ;;  %v131_v39 = vld [vmem:[%s1030_s1 + $0x338] sm:$0xff]  ;;  %v130_v43 = vld [vmem:[%s1030_s1 + $0x330] sm:$0xff]  ;;  %v97_v46 = vld [vmem:[%s1030_s1 + $0x228] sm:$0xff] }
  0x26   :  { %561 = vmatprep.subr.mxu1 %v155_v5  ;;  %527 = vmatpush3.msra.mxu0 %v107_v6  ;;  %v129_v47 = vld [vmem:[%s1030_s1 + $0x328] sm:$0xff]  ;;  %v112_v48 = vld [vmem:[%s1030_s1 + $0x2a0] sm:$0xff]  ;;  %v111_v52 = vld [vmem:[%s1030_s1 + $0x298] sm:$0xff] }
  0x27   :  { %562 = vmatpush3.msra.mxu1 %v139_v7  ;;  %528 = vmatprep.subr.mxu0 %v122_v8  ;;  %v144_v49 = vld [vmem:[%s1030_s1 + $0x3a0] sm:$0xff]  ;;  %v143_v53 = vld [vmem:[%s1030_s1 + $0x398] sm:$0xff]  ;;  %v110_v56 = vld [vmem:[%s1030_s1 + $0x290] sm:$0xff] }
  0x28   :  { %563 = vmatprep.subr.mxu1 %v154_v9  ;;  %529 = vmatpush3.msra.mxu0 %v106_v10  ;;  %v96_v50 = vld [vmem:[%s1030_s1 + $0x220] sm:$0xff]  ;;  %v95_v54 = vld [vmem:[%s1030_s1 + $0x218] sm:$0xff]  ;;  %v142_v57 = vld [vmem:[%s1030_s1 + $0x390] sm:$0xff] }
  0x29   :  { %564 = vmatpush3.msra.mxu1 %v138_v11  ;;  %530 = vmatprep.subr.mxu0 %v121_v12  ;;  %v128_v51 = vld [vmem:[%s1030_s1 + $0x320] sm:$0xff]  ;;  %v127_v55 = vld [vmem:[%s1030_s1 + $0x318] sm:$0xff]  ;;  %v94_v58 = vld [vmem:[%s1030_s1 + $0x210] sm:$0xff] }
  0x2a   :  { %565 = vmatprep.subr.mxu1 %v153_v13  ;;  %531 = vmatpush3.msra.mxu0 %v105_v14  ;;  %v126_v59 = vld [vmem:[%s1030_s1 + $0x310] sm:$0xff]  ;;  %v109_v60 = vld [vmem:[%s1030_s1 + $0x288] sm:$0xff]  ;;  %v108_v0 = vld [vmem:[%s1030_s1 + $0x280] sm:$0xff] }
  0x2b   :  { %566 = vmatpush3.msra.mxu1 %v137_v15  ;;  %532 = vmatprep.subr.mxu0 %v120_v16  ;;  %v141_v61 = vld [vmem:[%s1030_s1 + $0x388] sm:$0xff]  ;;  %v140_v1 = vld [vmem:[%s1030_s1 + $0x380] sm:$0xff]  ;;  %v27_v5 = vld [vmem:[%s1031_s0 + $0x38] sm:$0xff] }
  0x2c   :  { %567 = vmatprep.subr.mxu1 %v152_v17  ;;  %533 = vmatpush3.msra.mxu0 %v104_v18  ;;  %v93_v62 = vld [vmem:[%s1030_s1 + $0x208] sm:$0xff]  ;;  %v92_v2 = vld [vmem:[%s1030_s1 + $0x200] sm:$0xff]  ;;  %v26_v7 = vld [vmem:[%s1031_s0 + $0x30] sm:$0xff] }
  0x2d   :  { %568 = vmatpush3.msra.mxu1 %v136_v19  ;;  %534 = vmatprep.subr.mxu0 %v119_v20  ;;  %v125_v63 = vld [vmem:[%s1030_s1 + $0x308] sm:$0xff]  ;;  %v124_v4 = vld [vmem:[%s1030_s1 + $0x300] sm:$0xff] }
  0x2e   :  { %569 = vmatprep.subr.mxu1 %v151_v21  ;;  %535 = vmatpush3.msra.mxu0 %v103_v22  ;;  %v25_v3 = vld [vmem:[%s1031_s0 + $0x28] sm:$0xff]  ;;  %v24_v6 = vld [vmem:[%s1031_s0 + $0x20] sm:$0xff] }
  0x2f   :  { %570 = vmatpush3.msra.mxu1 %v135_v23  ;;  %536 = vmatprep.subr.mxu0 %v118_v24  ;;  %v455_v22 = vld [vmem:[%s1032_s2] ss:$0 sm:$0xff] }
  0x30   :  { %571 = vmatprep.subr.mxu1 %v150_v25  ;;  %537 = vmatpush3.msra.mxu0 %v102_v26 }
  0x31   :  { %572 = vmatpush3.msra.mxu1 %v134_v27  ;;  %538 = vmatprep.subr.mxu0 %v117_v28 }
  0x32   :  { %573 = vmatprep.subr.mxu1 %v149_v29  ;;  %539 = vmatpush3.msra.mxu0 %v101_v30 }
  0x33   :  { %574 = vmatpush3.msra.mxu1 %v133_v31  ;;  %540 = vmatprep.subr.mxu0 %v116_v32 }
  0x34   :  { %575 = vmatprep.subr.mxu1 %v148_v33  ;;  %541 = vmatpush3.msra.mxu0 %v100_v34 }
  0x35   :  { %576 = vmatpush3.msra.mxu1 %v132_v35  ;;  %542 = vmatprep.subr.mxu0 %v115_v36 }
  0x36   :  { %577 = vmatprep.subr.mxu1 %v147_v37  ;;  %543 = vmatpush3.msra.mxu0 %v99_v38 }
  0x37   :  { %578 = vmatpush3.msra.mxu1 %v131_v39  ;;  %544 = vmatprep.subr.mxu0 %v114_v40 }
  0x38   :  { %579 = vmatprep.subr.mxu1 %v146_v41  ;;  %545 = vmatpush3.msra.mxu0 %v98_v42 }
  0x39   :  { %580 = vmatpush3.msra.mxu1 %v130_v43  ;;  %546 = vmatprep.subr.mxu0 %v113_v44 }
  0x3a   :  { %581 = vmatprep.subr.mxu1 %v145_v45  ;;  %547 = vmatpush3.msra.mxu0 %v97_v46 }
  0x3b   :  { %582 = vmatpush3.msra.mxu1 %v129_v47  ;;  %548 = vmatprep.subr.mxu0 %v112_v48 }
  0x3c   :  { %583 = vmatprep.subr.mxu1 %v144_v49  ;;  %549 = vmatpush3.msra.mxu0 %v96_v50 }
  0x3d   :  { %584 = vmatpush3.msra.mxu1 %v128_v51  ;;  %550 = vmatprep.subr.mxu0 %v111_v52 }
  0x3e   :  { %585 = vmatprep.subr.mxu1 %v143_v53  ;;  %551 = vmatpush3.msra.mxu0 %v95_v54 }
  0x3f   :  { %586 = vmatpush3.msra.mxu1 %v127_v55  ;;  %552 = vmatprep.subr.mxu0 %v110_v56 }
  0x40   :  { %587 = vmatprep.subr.mxu1 %v142_v57  ;;  %553 = vmatpush3.msra.mxu0 %v94_v58 }
  0x41   :  { %588 = vmatpush3.msra.mxu1 %v126_v59  ;;  %554 = vmatprep.subr.mxu0 %v109_v60 }
  0x42   :  { %589 = vmatprep.subr.mxu1 %v141_v61  ;;  %555 = vmatpush3.msra.mxu0 %v93_v62 }
  0x43   :  { %590 = vmatpush3.msra.mxu1 %v125_v63  ;;  %556 = vmatprep.subr.mxu0 %v108_v0 }
  0x44   :  { %591 = vmatprep.subr.mxu1 %v140_v1  ;;  %557 = vmatpush3.msra.mxu0 %v92_v2 }
  0x45   :  { %360 = vmatprep.mubr.f32.mxu0 %v25_v3  ;;  %592 = vmatpush3.msra.mxu1 %v124_v4 }
  0x46   :  { %430 = vmatprep.mubr.f32.mxu1 %v27_v5  ;;  %361 = vmatmul.mubr.f32.vlgmr.msra.gmra.mxu0 %v24_v6 }
  0x47   :  { %431 = vmatmul.mubr.f32.vlgmr.msra.gmra.mxu1 %v26_v7 }
  0xe4   :  { %v488_v8 = vpop.f32.mrf.mxu0 }
  0xe5   :  { %v523_v9 = vpop.f32.mrf.mxu1 }
  0xe6   :  { %v489_v10 = vpop.f32.mrf.mxu0 }
  0xe7   :  { %v524_v11 = vpop.f32.mrf.mxu1  ;;  %v490_v12 = vadd.f32 %v489_v10, %v488_v8 }
  0xe8   :  { %v525_v13 = vadd.f32 %v524_v11, %v523_v9 }
  0xea   :  { %v293_v18 = vadd.f32 %v525_v13, %v490_v12 }
 0x106   :  { %v558_v14 = vpop.f32.mrf.mxu0 }
 0x107   :  { %v593_v15 = vpop.f32.mrf.mxu1 }
 0x108   :  { %v559_v16 = vpop.f32.mrf.mxu0 }
 0x109   :  { %v594_v17 = vpop.f32.mrf.mxu1  ;;  %v560_v19 = vadd.f32 %v559_v16, %v558_v14 }
 0x10a   :  { %v595_v21 = vadd.f32 %v594_v17, %v593_v15 }
 0x10b   :  { %v363_v20 = vadd.f32 %v560_v19, %v293_v18 }
 0x10d   :  { %v433_v23 = vadd.f32 %v595_v21, %v363_v20 }
 0x10f   :  { %v449_v24 = vadd.f32 %v455_v22, %v433_v23 }
 0x111   :  { %450 = vst [vmem:[%s1033_s3] sm:$0xff] %v449_v24 }

</bundles_post_ra>
